<compile_context>
chip_gen: v5e
topology: v5e:2x2
jax: 0.10.0
libtpu: 0.0.40
codegen_flags: <defaults>
</compile_context>

<pallas_src>
import jax
import jax.numpy as jnp
from jax.experimental import pallas as pl
from jax.experimental.pallas import tpu as pltpu


_IDENTITY = {"max": float("-inf"), "sum": 0.0, "prod": 1.0}
_COMBINE = {"max": jnp.maximum,
            "sum": lambda a, b: a + b,
            "prod": lambda a, b: a * b}
_REDUCE = {"max": jnp.max, "sum": jnp.sum, "prod": jnp.prod}

# Safe on every generation: v5e/v6e have 128 MiB physical VMEM, v7x has 64 MiB.
_VMEM_LIMIT_BYTES = 48 * 1024 * 1024
_TILE_BUDGET_BYTES = 16 * 1024 * 1024   # in-flight (double-buffered) tile budget


# ------------------------------------------------------------ tile sizing ---

def _feat_tile(d):
    """Feature-block width: full D for small/unaligned D, else a 128-multiple
    divisor so the feature axis can be gridded (and sharded across v7x TCs)."""
    if d <= 1024 or d % 128 != 0:
        return d
    for td in (1024, 512, 256, 128):
        if d % td == 0:
            return td
    return d


def _pick_row_tile(n, elems_per_row, itemsize, cap):
    """Largest multiple-of-8 row tile whose double-buffered footprint stays
    within budget, never larger than the row count (rounded down to 8)."""
    if n < 8:
        return n                       # full first dim -> always a legal block
    tr = 8
    while (tr < cap and tr < n
           and (2 * tr) * elems_per_row * itemsize <= _TILE_BUDGET_BYTES):
        tr *= 2
    return max(8, min(tr, (n // 8) * 8))


# ---------------------------------------------------------------- kernels ---

def _sb_cat_kernel(p_ref, m_ref, o_ref):
    # out[:, :Dp] = patches ; out[:, Dp:] = metadata   (torch.cat dim=1)
    # Dp is guaranteed to be a multiple of 128 -> both stores are lane-aligned.
    dp = p_ref.shape[1]
    o_ref[:, :dp] = p_ref[...].astype(o_ref.dtype)
    o_ref[:, dp:] = m_ref[...].astype(o_ref.dtype)


def _make_sb_reduce_kernel(method, n_rows, tile_rows, td):
    """Streamed reduction over dim 0 of cat([patches, metadata], dim=0)."""
    combine = _COMBINE[method]
    reduce_fn = _REDUCE[method]
    identity = _IDENTITY[method]
    need_mask = (n_rows % tile_rows) != 0      # last row tile is partial
    n_chunks = tile_rows // 8

    def kernel(p_ref, m_ref, o_ref, acc_ref):
        r = pl.program_id(1)                   # row (reduction) axis, last

        @pl.when(r == 0)
        def _init():
            acc_ref[...] = jnp.full((8, td), identity, dtype=jnp.float32)

        if need_mask:
            # hoisted once per grid step (not per chunk)
            sub_iota = jax.lax.broadcasted_iota(jnp.int32, (8, td), 0)
            row0 = r * tile_rows

        # Fold the (TR, TD) tile into the (8, TD) accumulator with pure VPU
        # elementwise combines (no per-tile cross-sublane XLU reduce).
        acc = acc_ref[...]
        for c in range(n_chunks):
            chunk = p_ref[pl.ds(c * 8, 8), :].astype(jnp.float32)
            if need_mask:
                limit = n_rows - (row0 + c * 8)       # scalar
                chunk = jnp.where(sub_iota < limit, chunk,
                                  jnp.float32(identity))
            acc = combine(acc, chunk)
        acc_ref[...] = acc

        @pl.when(r == pl.num_programs(1) - 1)
        def _finalize():
            m = m_ref[...].astype(jnp.float32)
            m_red = reduce_fn(m, axis=0, keepdims=True)          # once per f
            a_red = reduce_fn(acc_ref[...], axis=0, keepdims=True)
            o_ref[...] = combine(a_red, m_red).astype(o_ref.dtype)

    return kernel


# ----------------------------------------------------------- sb execution ---

def _sb_cat(patches, metadata):
    n, dp = patches.shape
    dm = metadata.shape[1]
    out_dtype = jnp.result_type(patches.dtype, metadata.dtype)

    # Lane-unaligned splice (Dp % 128 != 0) would mean masked vst + relayout in
    # the kernel; concat is pure data movement, so let XLA do it in that case.
    if dp % 128 != 0:
        return jnp.concatenate([patches.astype(out_dtype),
                                metadata.astype(out_dtype)], axis=1)

    itemsize = jnp.dtype(out_dtype).itemsize
    # per row (double-buffered in the helper): two inputs + one output
    tr = _pick_row_tile(n, 2 * (dp + dm), itemsize, cap=1024)
    grid = (pl.cdiv(n, tr),)

    return pl.pallas_call(
        _sb_cat_kernel,
        out_shape=jax.ShapeDtypeStruct((n, dp + dm), out_dtype),
        grid_spec=pltpu.PrefetchScalarGridSpec(
            num_scalar_prefetch=0,
            grid=grid,
            in_specs=[pl.BlockSpec((tr, dp), lambda i: (i, 0)),
                      pl.BlockSpec((tr, dm), lambda i: (i, 0))],
            out_specs=pl.BlockSpec((tr, dp + dm), lambda i: (i, 0))),
        compiler_params=pltpu.CompilerParams(
            dimension_semantics=("parallel",),
            vmem_limit_bytes=_VMEM_LIMIT_BYTES),
    )(patches, metadata)


def _sb_reduce(method, patches, metadata):
    out_dtype = jnp.result_type(patches.dtype, metadata.dtype)
    d = patches.shape[1]
    identity = _IDENTITY[method]

    # Tiny row counts: pad to one full 8-sublane tile with the identity value
    # (negligible copy; avoids blocks larger than the array).
    n = patches.shape[0]
    if n < 8:
        patches = jnp.pad(patches, ((0, 8 - n), (0, 0)),
                          constant_values=identity)
        n = 8

    # Very large metadata: pre-reduce it once in XLA so the per-feature-block
    # metadata buffer inside the kernel stays tiny (typical metadata is a few
    # rows, so this branch rarely triggers).
    km = metadata.shape[0]
    if km * d * jnp.dtype(metadata.dtype).itemsize > 4 * 1024 * 1024:
        metadata = _REDUCE[method](metadata.astype(jnp.float32), axis=0,
                                   keepdims=True)
        km = 1

    td = _feat_tile(d)
    nf = d // td
    itemsize = jnp.dtype(patches.dtype).itemsize
    tr = _pick_row_tile(n, 2 * td, itemsize, cap=512)
    nr = pl.cdiv(n, tr)

    kernel = _make_sb_reduce_kernel(method, n, tr, td)

    return pl.pallas_call(
        kernel,
        out_shape=jax.ShapeDtypeStruct((1, d), out_dtype),
        grid_spec=pltpu.PrefetchScalarGridSpec(
            num_scalar_prefetch=0,
            grid=(nf, nr),                                   # rows last
            in_specs=[pl.BlockSpec((tr, td), lambda f, r: (r, f)),
                      pl.BlockSpec((km, td), lambda f, r: (0, f))],
            out_specs=pl.BlockSpec((1, td), lambda f, r: (0, f)),
            scratch_shapes=[pltpu.VMEM((8, td), jnp.float32)]),
        compiler_params=pltpu.CompilerParams(
            dimension_semantics=("parallel", "arbitrary"),
            vmem_limit_bytes=_VMEM_LIMIT_BYTES),
    )(patches, metadata)


# ----------------------------------------------------------- mb execution ---

def _mb_forward(method, patches, metadata):
    # Multi-branch tensors are a couple of vregs at most; pallas_call dispatch
    # plus (8,128) padding would dominate, so use plain (fused) XLA ops here.
    out_dtype = jnp.result_type(patches.dtype, metadata.dtype)
    if method == "cat":
        m = jnp.broadcast_to(metadata, (patches.shape[0], metadata.shape[1]))
        return jnp.concatenate([patches.astype(out_dtype),
                                m.astype(out_dtype)], axis=1)
    m_red = _REDUCE[method](metadata.astype(jnp.float32), axis=0,
                            keepdims=True)
    out = _COMBINE[method](patches.astype(jnp.float32), m_red)
    return out.astype(out_dtype)


# ---------------------------------------------------------------- wrapper ---

class Fusion:
    """JAX/Pallas port of the PyTorch Fusion multimodal aggregator."""

    def __init__(self, method, clam_type):
        methods = ["cat", "max", "sum", "prod"]
        if method not in methods:
            raise ValueError('"method" must be one of ', methods)
        self.method = method
        self.clam_type = clam_type

    def __call__(self, patches, metadata):
        if self.clam_type == "sb":
            if self.method == "cat":
                return _sb_cat(patches, metadata)
            return _sb_reduce(self.method, patches, metadata)
        return _mb_forward(self.method, patches, metadata)


# -------------------------------------------------------------- reference ---

def _ref(method, clam_type, patches, metadata):
    if clam_type == "sb":
        if method == "cat":
            return jnp.concatenate([patches, metadata], axis=1)
        x0 = jnp.concatenate([patches, metadata], axis=0)
        if method == "max":
            return jnp.max(x0, axis=0, keepdims=True)
        if method == "sum":
            return jnp.sum(x0, axis=0, keepdims=True)
        return jnp.prod(x0, axis=0, keepdims=True)
    else:
        if method == "cat":
            m1 = jnp.concatenate([patches[0:1], metadata], axis=1)
            m2 = jnp.concatenate([patches[1:2], metadata], axis=1)
            return jnp.concatenate([m1, m2], axis=0)
        outs = []
        for i in range(2):
            xi = jnp.concatenate([patches[i:i + 1], metadata], axis=0)
            if method == "max":
                outs.append(jnp.max(xi, axis=0, keepdims=True))
            elif method == "sum":
                outs.append(jnp.sum(xi, axis=0, keepdims=True))
            else:
                outs.append(jnp.prod(xi, axis=0, keepdims=True))
        return jnp.concatenate(outs, axis=0)


# ------------------------------------------------------------------- main ---

if __name__ == "__main__":
    key = jax.random.PRNGKey(0)
    ks = jax.random.split(key, 6)

    tests = [
        # single-branch, lane-aligned D, rows divisible by 8
        ("sb",
         jax.random.uniform(ks[0], (8, 128), jnp.float32, 0.5, 1.5),
         jax.random.uniform(ks[1], (8, 128), jnp.float32, 0.5, 1.5)),
        # single-branch, multi-tile row grid with a partial last tile
        # (exercises streamed accumulator + edge masking)
        ("sb",
         jax.random.uniform(ks[2], (20, 256), jnp.float32, 0.5, 1.5),
         jax.random.uniform(ks[3], (20, 256), jnp.float32, 0.5, 1.5)),
        # multi-branch: one row per branch, shared metadata row
        ("mb",
         jax.random.uniform(ks[4], (2, 128), jnp.float32, 0.5, 1.5),
         jax.random.uniform(ks[5], (1, 128), jnp.float32, 0.5, 1.5)),
    ]

    ok = True
    for clam_type, p, m in tests:
        for method in ("cat", "max", "sum", "prod"):
            fusion = Fusion(method, clam_type)
            out = jax.block_until_ready(fusion(p, m))
            ref = _ref(method, clam_type, p, m)
            if out.shape != ref.shape or not jnp.allclose(out, ref,
                                                          rtol=1e-4,
                                                          atol=1e-5):
                ok = False
                print(f"MISMATCH method={method} clam_type={clam_type} "
                      f"shapes={p.shape}/{m.shape}")

    if ok:
        print("KERNEL_OK")
</pallas_src>

<mosaic_0001>
module attributes {stable_mosaic.version = 11 : i64} {
  func.func @_sb_cat_kernel(%arg0: i32, %arg1: memref<8x128xf32, #tpu.memory_space<vmem>>, %arg2: memref<8x128xf32, #tpu.memory_space<vmem>>, %arg3: memref<8x256xf32, #tpu.memory_space<vmem>>) attributes {dimension_semantics = [#tpu.dimension_semantics<parallel>], iteration_bounds = array<i64: 1>, scalar_prefetch = 0 : i64, scratch_operands = 0 : i64, tpu.core_type = #tpu.core_type<tc>, window_params = [{transform_indices = @transform_0, window_bounds = array<i64: 8, 128>}, {transform_indices = @transform_1, window_bounds = array<i64: 8, 128>}, {transform_indices = @transform_2, window_bounds = array<i64: 8, 256>}]} {
    %c0 = arith.constant 0 : index
    %c0_0 = arith.constant 0 : index
    %0 = vector.load %arg1[%c0, %c0_0] : memref<8x128xf32, #tpu.memory_space<vmem>>, vector<8x128xf32>
    %c0_1 = arith.constant 0 : index
    %c0_2 = arith.constant 0 : index
    %1 = vector.load %arg3[%c0_1, %c0_2] : memref<8x256xf32, #tpu.memory_space<vmem>>, vector<8x128xf32>
    tpu.vector_store %arg3[%c0_1, %c0_2], %0 {strides = array<i32>} : memref<8x256xf32, #tpu.memory_space<vmem>>, vector<8x128xf32>,
    %c0_3 = arith.constant 0 : index
    %c0_4 = arith.constant 0 : index
    %2 = vector.load %arg2[%c0_3, %c0_4] : memref<8x128xf32, #tpu.memory_space<vmem>>, vector<8x128xf32>
    %c0_5 = arith.constant 0 : index
    %c128 = arith.constant 128 : index
    %3 = vector.load %arg3[%c0_5, %c128] : memref<8x256xf32, #tpu.memory_space<vmem>>, vector<8x128xf32>
    tpu.vector_store %arg3[%c0_5, %c128], %2 {strides = array<i32>} : memref<8x256xf32, #tpu.memory_space<vmem>>, vector<8x128xf32>,
    return
  }
  func.func @transform_0(%arg0: i32) -> (i32, i32) {
    %c0_i32 = arith.constant 0 : i32
    %c0_i32_0 = arith.constant 0 : i32
    return %arg0, %c0_i32 : i32, i32
  }
  func.func @transform_1(%arg0: i32) -> (i32, i32) {
    %c0_i32 = arith.constant 0 : i32
    %c0_i32_0 = arith.constant 0 : i32
    return %arg0, %c0_i32 : i32, i32
  }
  func.func @transform_2(%arg0: i32) -> (i32, i32) {
    %c0_i32 = arith.constant 0 : i32
    %c0_i32_0 = arith.constant 0 : i32
    return %arg0, %c0_i32 : i32, i32
  }
}

</mosaic_0001>

<bundles_post_ra>
// kernel: tpu_custom_call.1
= control target key start
LH: loop header
LB: loop body
LE: loop exit
PB: predicated region body
PF: predicated region fallthrough
CT: control target
= control target key end

     0   :  { %7 = vsyncpa [#allocation3], 0  ;;  %s170_s0 = inlined_call_operand.hbm [shape: f32[8,128], index: 0, kind: input, shape index: {}]   ;;  %s171_s1 = inlined_call_operand.hbm [shape: f32[8,128], index: 1, kind: input, shape index: {}]   ;;  %s172_s2 = inlined_call_operand.hbm [shape: f32[8,256], index: 2, kind: output, shape index: {}]  }
   0x1   :  { %8 = vsyncpa [#allocation6], 0 }
   0x2   :  { %9 = vsyncpa [#allocation4], 0  ;;  %s15_s11 = sshll.u32 %s170_s0, 4  ;;  %s143_s12 = smov [#allocation2]   ;;  %s16_s11 = int_to_ptr.hbm [resolvable:$true] %s15_s11 }
   0x3   :  { %s17_s13 = sshll.u32 %s143_s12, 4  ;;  %s26_s16 = sshll.u32 %s171_s1, 4  ;;  %s18_s13 = int_to_ptr.vmem [resolvable:$true] %s17_s13  ;;  %s27_s16 = int_to_ptr.hbm [resolvable:$true] %s26_s16 }
   0x4   :  { %20 = dma.hbm_to_vmem [thread:$0]  %s16_s11, 128, %s18_s13, [#allocation3]  }
   0x5   :  { %s144_s17 = smov [#allocation5]  }
   0x6   :  { %s28_s18 = sshll.u32 %s144_s17, 4  ;;  %s29_s18 = int_to_ptr.vmem [resolvable:$true] %s28_s18 }
   0x7   :  { %31 = dma.hbm_to_vmem [thread:$0]  %s27_s16, 128, %s29_s18, [#allocation6]  }
   0x8   :  { %137 = dma.done.wait [#allocation3], 128  }
   0x9   :  { %138 = vsyncadd [#allocation3], 4294967168 }
   0xa   :  { %139 = dma.done.wait [#allocation6], 128  }
   0xb   :  { %140 = vsyncadd [#allocation6], 4294967168  ;;  %s145_s19 = smov [#allocation7]   ;;  %s51_s22 = sshll.u32 %s172_s2, 4  ;;  %v40_v0 = vld [vmem:[#allocation2] sm:$0xff]  ;;  %v42_v1 = vld [vmem:[#allocation5] sm:$0xff]  ;;  %s52_s22 = int_to_ptr.hbm [resolvable:$true] %s51_s22 }
   0xc   :  { %s49_s0 = sshll.u32 %s145_s19, 4  ;;  %41 = vst [vmem:[#allocation7] sm:$0xff] %v40_v0  ;;  %s50_s0 = int_to_ptr.vmem [resolvable:$true] %s49_s0 }
   0xd   :  { %43 = vst [vmem:[#allocation7 + $0x8] sm:$0xff] %v42_v1 }
   0xe   :  { %54 = dma.vmem_to_hbm [thread:$0]  %s50_s0, 256, %s52_s22, [#allocation4]  }
   0xf   :  { %141 = dma.done.wait [#allocation4], 256  }
  0x10   :  { %142 = vsyncadd [#allocation4], 4294967040 }
  0x11   :  { %59 = vsyncpa [#allocation3], 1 }
  0x12   :  { %60 = vsyncpa [#allocation6], 1 }
  0x13   :  { %61 = vsyncpa [#allocation4], 1 }

</bundles_post_ra>
